<compile_context>
chip_gen: v7x
topology: tpu7x:2x2x1
jax: 0.10.0
libtpu: 0.0.40
codegen_flags: <defaults>
</compile_context>

<pallas_src>
import functools

import numpy as np
import jax
import jax.numpy as jnp
from jax.experimental import pallas as pl
from jax.experimental.pallas import tpu as pltpu


# ----------------------------------------------------------------------------
# Fused Conv2d(valid, no bias) + folded BatchNorm + PReLU as a single banded
# GEMM per (image, row-tile).
# ----------------------------------------------------------------------------
def _conv_gemm_bn_prelu_kernel(x_ref, rhs_ref, scale_ref, shift_ref, alpha_ref,
                               o_ref, *, slabs, th):
    # x_ref:     (1, 1, P, R, Wp)    stride-parity / channel planes (W on lanes)
    # rhs_ref:   (len(slabs)*Wp, Cout*Wout)  block-banded conv weights
    # scale_ref: (1, Cout*Wout)      folded BN scale (repeated per column)
    # shift_ref: (1, Cout*Wout)      folded BN shift
    # alpha_ref: (1, 1)              PReLU shared slope
    # o_ref:     (1, 1, th, Cout*Wout)  lane-dense packed output tile
    #
    # "im2col" = lane-concatenation of unit-stride slabs; the patch/tap
    # bookkeeping lives in the banded rhs, so this is ONE matmul per tile.
    lhs = jnp.concatenate(
        [x_ref[0, 0, p, dy:dy + th, :] for (p, dy) in slabs], axis=1)
    z = jnp.dot(lhs, rhs_ref[...], preferred_element_type=jnp.float32)
    # Folded (eval-mode) BatchNorm, then PReLU with a single shared slope.
    z = z * scale_ref[...] + shift_ref[...]
    z = jnp.where(z > 0, z, alpha_ref[...] * z)
    o_ref[0, 0] = z


def _pick_row_tile(h_out, n_planes, wp, n_slabs, nout,
                   budget_bytes=4 * 1024 * 1024):
    """Choose the output-row tile height from a VMEM byte budget (f32).

    Per output row we keep: 2x input rows (double buffered), 2x output row
    (double buffered) and one im2col lhs row.  Sized well under the 32 MiB
    scoped limit we request (and under v7x's 64 MiB physical VMEM).
    """
    bytes_per_row = 4 * (2 * n_planes * wp + 2 * nout + n_slabs * wp)
    th = budget_bytes // max(bytes_per_row, 1)
    return int(max(1, min(h_out, th)))


def conv_bn_prelu_layer(x, w_hwio, scale, shift, alpha, stride):
    """One BasicConv stage. x: (N, Cin, H, W) NCHW. w_hwio: (kh, kw, Cin, Cout)."""
    n, cin, h, w_in = x.shape
    kh, kw, wcin, cout = w_hwio.shape
    assert wcin == cin
    s = int(stride)
    h_out = (h - kh) // s + 1
    w_out = (w_in - kw) // s + 1
    qy_max = (kh - 1) // s
    qx_max = (kw - 1) // s
    hp = h_out + qy_max
    wp = w_out + qx_max

    # --- stride-parity (space-to-depth) planes: every in-kernel access is
    # unit-stride.  For stride=1 this is just the channel planes.
    parts = []
    for ci in range(cin):
        for py in range(s):
            for px in range(s):
                sub = x[:, ci, py::s, px::s]
                sub = sub[:, :hp, :wp]
                pad_h = hp - sub.shape[1]
                pad_w = wp - sub.shape[2]
                if pad_h or pad_w:
                    sub = jnp.pad(sub, ((0, 0), (0, pad_h), (0, pad_w)))
                parts.append(sub)
    planes = jnp.stack(parts, axis=1)            # (N, Cin*s*s, hp, wp)
    n_planes = cin * s * s

    # --- slab list (plane, row offset) + block-banded GEMM weight.
    # rhs[(slab, v), co*Wout + wo] = W[ky, kx, ci, co] where v = qx + wo,
    # so   lhs @ rhs  ==  valid conv with stride s, already packed (co, wo).
    w_np = np.asarray(w_hwio, dtype=np.float32)
    slabs = []
    taps_per_slab = []
    for ky in range(kh):
        py, qy = ky % s, ky // s
        for ci in range(cin):
            for px in range(s):
                plane = ci * s * s + py * s + px
                taps = []
                for qx in range((kw - px + s - 1) // s):
                    kx = qx * s + px
                    taps.append((qx, w_np[ky, kx, ci, :]))
                slabs.append((plane, qy))
                taps_per_slab.append(taps)
    n_slabs = len(slabs)
    k_dim = n_slabs * wp
    nout = cout * w_out
    rhs = np.zeros((k_dim, nout), dtype=np.float32)
    cols = np.arange(cout) * w_out
    for sidx, taps in enumerate(taps_per_slab):
        for (dx, wvec) in taps:
            for wo in range(w_out):
                rhs[sidx * wp + dx + wo, cols + wo] = wvec
    rhs = jnp.asarray(rhs)

    # --- row tiling (bounded per-step VMEM; overlap/halo baked into tiles).
    th = _pick_row_tile(h_out, n_planes, wp, n_slabs, nout)
    n_tiles = -(-h_out // th)
    pad_rows = n_tiles * th + qy_max - hp
    if pad_rows > 0:
        planes = jnp.pad(planes, ((0, 0), (0, 0), (0, pad_rows), (0, 0)))
    r = th + qy_max
    x_tiles = jnp.stack(
        [planes[:, :, t0 * th:t0 * th + r, :] for t0 in range(n_tiles)], axis=1)
    # x_tiles: (N, T, P, R, Wp)

    scale_pk = jnp.repeat(jnp.asarray(scale, jnp.float32), w_out)[None, :]
    shift_pk = jnp.repeat(jnp.asarray(shift, jnp.float32), w_out)[None, :]
    alpha_pk = jnp.asarray(alpha, jnp.float32).reshape(1, 1)

    kernel = functools.partial(_conv_gemm_bn_prelu_kernel, slabs=slabs, th=th)

    out_tiles = pl.pallas_call(
        kernel,
        out_shape=jax.ShapeDtypeStruct((n, n_tiles, th, nout), jnp.float32),
        grid_spec=pltpu.PrefetchScalarGridSpec(
            num_scalar_prefetch=0,
            grid=(n, n_tiles),
            in_specs=[
                # streaming input tile (default double buffering; sweep
                # pipeline_mode=pl.Buffered(3) if DMA latency is exposed)
                pl.BlockSpec((1, 1, n_planes, r, wp),
                             lambda i, j: (i, j, 0, 0, 0)),
                # constant-index operands: fetched once, stay resident
                pl.BlockSpec((k_dim, nout), lambda i, j: (0, 0)),
                pl.BlockSpec((1, nout), lambda i, j: (0, 0)),
                pl.BlockSpec((1, nout), lambda i, j: (0, 0)),
                pl.BlockSpec((1, 1), lambda i, j: (0, 0)),
            ],
            out_specs=pl.BlockSpec((1, 1, th, nout),
                                   lambda i, j: (i, j, 0, 0)),
        ),
        compiler_params=pltpu.CompilerParams(
            dimension_semantics=("parallel", "parallel"),
            vmem_limit_bytes=32 * 1024 * 1024),
    )(x_tiles, rhs, scale_pk, shift_pk, alpha_pk)

    # Undo the lane-dense (co, wo) packing in the wrapper -> NCHW.
    out = out_tiles.reshape(n, n_tiles, th, cout, w_out)
    out = jnp.transpose(out, (0, 3, 1, 2, 4)).reshape(
        n, cout, n_tiles * th, w_out)
    return out[:, :, :h_out, :]


def basic_conv_forward(x, params):
    """BasicConv.forward. x: (N, H, W) or (N, 1, H, W) in PyTorch NCHW convention."""
    if x.ndim < 4:                       # x = x.unsqueeze(1)
        x = x[:, None, :, :]
    # filled == False -> no padding; dropout p=0 -> no-op.
    for (w_hwio, scale, shift, alpha, stride) in params:
        x = conv_bn_prelu_layer(x, w_hwio, scale, shift, alpha, stride)
    return x                             # NCHW


# ----------------------------------------------------------------------------
# Pure-JAX reference (XLA conv) used only for a correctness check.
# ----------------------------------------------------------------------------
def reference_forward(x, params):
    if x.ndim < 4:
        x = x[:, None, :, :]
    for (w, scale, shift, alpha, s) in params:
        x = jax.lax.conv_general_dilated(
            x, w, window_strides=(s, s), padding="VALID",
            dimension_numbers=("NCHW", "HWIO", "NCHW"))
        x = x * scale[None, :, None, None] + shift[None, :, None, None]
        x = jnp.where(x > 0, x, alpha * x)
    return x


# ----------------------------------------------------------------------------
# Deterministic parameter construction (synthetic, no checkpoint).
# ----------------------------------------------------------------------------
def make_params(layer_sizes, units, unit_scaling=1, key=None):
    key = jax.random.PRNGKey(0) if key is None else key
    params = []
    nin = 1
    eps = 1e-5
    for i, k_sz in enumerate(layer_sizes):
        is_last = (i == len(layer_sizes) - 1)
        stride = 1 if is_last else 2
        key, wk = jax.random.split(key)
        fan_in = nin * k_sz * k_sz
        w = jax.random.normal(wk, (k_sz, k_sz, nin, units), jnp.float32)
        w = w * (1.0 / np.sqrt(fan_in))
        # eval-mode BatchNorm parameters (deterministic, non-trivial), folded.
        gamma = 1.0 + 0.05 * jnp.arange(units, dtype=jnp.float32)
        beta = 0.02 * jnp.arange(units, dtype=jnp.float32)
        r_mean = 0.01 * jnp.arange(units, dtype=jnp.float32)
        r_var = 1.0 + 0.10 * jnp.arange(units, dtype=jnp.float32)
        scale = gamma / jnp.sqrt(r_var + eps)
        shift = beta - r_mean * scale
        alpha = jnp.float32(0.25)  # nn.PReLU() default init
        params.append((w, scale, shift, alpha, stride))
        nin = units
        units *= unit_scaling
    return params


if __name__ == "__main__":
    # Small config: layers=[5, 3], units=8, input (N=2, H=16, W=16) (no channel
    # dim -> exercises the unsqueeze(1) path of forward()).
    layer_sizes = [5, 3]
    units = 8
    params = make_params(layer_sizes, units)

    key = jax.random.PRNGKey(0)
    x = jax.random.normal(key, (2, 16, 16), jnp.float32)

    fwd = jax.jit(lambda inp: basic_conv_forward(inp, params))
    out = jax.block_until_ready(fwd(x))          # (2, 8, 4, 4) NCHW

    ref = jax.block_until_ready(reference_forward(x, params))
    assert out.shape == ref.shape == (2, units, 4, 4), (out.shape, ref.shape)
    # Default (bf16-based) MXU precision in both paths -> relaxed tolerance.
    np.testing.assert_allclose(np.asarray(out), np.asarray(ref),
                               rtol=2e-2, atol=2e-2)
    print("KERNEL_OK")
</pallas_src>

<mosaic_0001>
module attributes {stable_mosaic.version = 11 : i64} {
  func.func @_conv_gemm_bn_prelu_kernel(%arg0: i32, %arg1: i32, %arg2: memref<1x1x4x8x8xf32, #tpu.memory_space<vmem>>, %arg3: memref<80x48xf32, #tpu.memory_space<vmem>>, %arg4: memref<1x48xf32, #tpu.memory_space<vmem>>, %arg5: memref<1x48xf32, #tpu.memory_space<vmem>>, %arg6: memref<1x1xf32, #tpu.memory_space<vmem>>, %arg7: memref<1x1x6x48xf32, #tpu.memory_space<vmem>>) attributes {dimension_semantics = [#tpu.dimension_semantics<parallel>, #tpu.dimension_semantics<parallel>], iteration_bounds = array<i64: 2, 1>, scalar_prefetch = 0 : i64, scratch_operands = 0 : i64, tpu.core_type = #tpu.core_type<tc>, window_params = [{transform_indices = @transform_0, window_bounds = array<i64: 1, 1, 4, 8, 8>}, {pipeline_mode = #tpu.pipeline_mode<synchronous>, transform_indices = @transform_1, window_bounds = array<i64: 80, 48>}, {pipeline_mode = #tpu.pipeline_mode<synchronous>, transform_indices = @transform_2, window_bounds = array<i64: 1, 48>}, {pipeline_mode = #tpu.pipeline_mode<synchronous>, transform_indices = @transform_3, window_bounds = array<i64: 1, 48>}, {pipeline_mode = #tpu.pipeline_mode<synchronous>, transform_indices = @transform_4, window_bounds = array<i64: 1, 1>}, {transform_indices = @transform_5, window_bounds = array<i64: 1, 1, 6, 48>}]} {
    %c0 = arith.constant 0 : index
    %c0_0 = arith.constant 0 : index
    %c0_1 = arith.constant 0 : index
    %c0_2 = arith.constant 0 : index
    %c0_3 = arith.constant 0 : index
    %0 = vector.load %arg2[%c0, %c0_0, %c0_1, %c0_2, %c0_3] : memref<1x1x4x8x8xf32, #tpu.memory_space<vmem>>, vector<1x1x1x6x8xf32>
    %1 = vector.shape_cast %0 : vector<1x1x1x6x8xf32> to vector<6x8xf32>
    %c0_4 = arith.constant 0 : index
    %c0_5 = arith.constant 0 : index
    %c1 = arith.constant 1 : index
    %c0_6 = arith.constant 0 : index
    %c0_7 = arith.constant 0 : index
    %2 = vector.load %arg2[%c0_4, %c0_5, %c1, %c0_6, %c0_7] : memref<1x1x4x8x8xf32, #tpu.memory_space<vmem>>, vector<1x1x1x6x8xf32>
    %3 = vector.shape_cast %2 : vector<1x1x1x6x8xf32> to vector<6x8xf32>
    %c0_8 = arith.constant 0 : index
    %c0_9 = arith.constant 0 : index
    %c2 = arith.constant 2 : index
    %c0_10 = arith.constant 0 : index
    %c0_11 = arith.constant 0 : index
    %4 = vector.load %arg2[%c0_8, %c0_9, %c2, %c0_10, %c0_11] : memref<1x1x4x8x8xf32, #tpu.memory_space<vmem>>, vector<1x1x1x6x8xf32>
    %5 = vector.shape_cast %4 : vector<1x1x1x6x8xf32> to vector<6x8xf32>
    %c0_12 = arith.constant 0 : index
    %c0_13 = arith.constant 0 : index
    %c3 = arith.constant 3 : index
    %c0_14 = arith.constant 0 : index
    %c0_15 = arith.constant 0 : index
    %6 = vector.load %arg2[%c0_12, %c0_13, %c3, %c0_14, %c0_15] : memref<1x1x4x8x8xf32, #tpu.memory_space<vmem>>, vector<1x1x1x6x8xf32>
    %7 = vector.shape_cast %6 : vector<1x1x1x6x8xf32> to vector<6x8xf32>
    %c0_16 = arith.constant 0 : index
    %c0_17 = arith.constant 0 : index
    %c0_18 = arith.constant 0 : index
    %c1_19 = arith.constant 1 : index
    %c0_20 = arith.constant 0 : index
    %8 = vector.load %arg2[%c0_16, %c0_17, %c0_18, %c1_19, %c0_20] : memref<1x1x4x8x8xf32, #tpu.memory_space<vmem>>, vector<1x1x1x6x8xf32>
    %9 = vector.shape_cast %8 : vector<1x1x1x6x8xf32> to vector<6x8xf32>
    %c0_21 = arith.constant 0 : index
    %c0_22 = arith.constant 0 : index
    %c1_23 = arith.constant 1 : index
    %c1_24 = arith.constant 1 : index
    %c0_25 = arith.constant 0 : index
    %10 = vector.load %arg2[%c0_21, %c0_22, %c1_23, %c1_24, %c0_25] : memref<1x1x4x8x8xf32, #tpu.memory_space<vmem>>, vector<1x1x1x6x8xf32>
    %11 = vector.shape_cast %10 : vector<1x1x1x6x8xf32> to vector<6x8xf32>
    %c0_26 = arith.constant 0 : index
    %c0_27 = arith.constant 0 : index
    %c2_28 = arith.constant 2 : index
    %c1_29 = arith.constant 1 : index
    %c0_30 = arith.constant 0 : index
    %12 = vector.load %arg2[%c0_26, %c0_27, %c2_28, %c1_29, %c0_30] : memref<1x1x4x8x8xf32, #tpu.memory_space<vmem>>, vector<1x1x1x6x8xf32>
    %13 = vector.shape_cast %12 : vector<1x1x1x6x8xf32> to vector<6x8xf32>
    %c0_31 = arith.constant 0 : index
    %c0_32 = arith.constant 0 : index
    %c3_33 = arith.constant 3 : index
    %c1_34 = arith.constant 1 : index
    %c0_35 = arith.constant 0 : index
    %14 = vector.load %arg2[%c0_31, %c0_32, %c3_33, %c1_34, %c0_35] : memref<1x1x4x8x8xf32, #tpu.memory_space<vmem>>, vector<1x1x1x6x8xf32>
    %15 = vector.shape_cast %14 : vector<1x1x1x6x8xf32> to vector<6x8xf32>
    %c0_36 = arith.constant 0 : index
    %c0_37 = arith.constant 0 : index
    %c0_38 = arith.constant 0 : index
    %c2_39 = arith.constant 2 : index
    %c0_40 = arith.constant 0 : index
    %16 = vector.load %arg2[%c0_36, %c0_37, %c0_38, %c2_39, %c0_40] : memref<1x1x4x8x8xf32, #tpu.memory_space<vmem>>, vector<1x1x1x6x8xf32>
    %17 = vector.shape_cast %16 : vector<1x1x1x6x8xf32> to vector<6x8xf32>
    %c0_41 = arith.constant 0 : index
    %c0_42 = arith.constant 0 : index
    %c1_43 = arith.constant 1 : index
    %c2_44 = arith.constant 2 : index
    %c0_45 = arith.constant 0 : index
    %18 = vector.load %arg2[%c0_41, %c0_42, %c1_43, %c2_44, %c0_45] : memref<1x1x4x8x8xf32, #tpu.memory_space<vmem>>, vector<1x1x1x6x8xf32>
    %19 = vector.shape_cast %18 : vector<1x1x1x6x8xf32> to vector<6x8xf32>
    %20 = tpu.concatenate %1, %3, %5, %7, %9, %11, %13, %15, %17, %19 in 1 : vector<6x8xf32>, vector<6x8xf32>, vector<6x8xf32>, vector<6x8xf32>, vector<6x8xf32>, vector<6x8xf32>, vector<6x8xf32>, vector<6x8xf32>, vector<6x8xf32>, vector<6x8xf32> -> vector<6x80xf32>
    %c0_46 = arith.constant 0 : index
    %c0_47 = arith.constant 0 : index
    %21 = vector.load %arg3[%c0_46, %c0_47] : memref<80x48xf32, #tpu.memory_space<vmem>>, vector<80x48xf32>
    %cst = arith.constant dense<0.000000e+00> : vector<6x48xf32>
    %22 = tpu.matmul %20, %21, %cst {dimension_numbers = #tpu.dot_dimension_numbers<[1], [0], [0], [1], [0, 0, 1, 1], [], []>} : vector<6x80xf32>, vector<80x48xf32>, vector<6x48xf32> -> vector<6x48xf32>
    %c0_48 = arith.constant 0 : index
    %c0_49 = arith.constant 0 : index
    %23 = vector.load %arg4[%c0_48, %c0_49] : memref<1x48xf32, #tpu.memory_space<vmem>>, vector<1x48xf32>
    %24 = vector.broadcast %23 : vector<1x48xf32> to vector<6x48xf32>
    %25 = arith.mulf %22, %24 : vector<6x48xf32>
    %c0_50 = arith.constant 0 : index
    %c0_51 = arith.constant 0 : index
    %26 = vector.load %arg5[%c0_50, %c0_51] : memref<1x48xf32, #tpu.memory_space<vmem>>, vector<1x48xf32>
    %27 = vector.broadcast %26 : vector<1x48xf32> to vector<6x48xf32>
    %28 = arith.addf %25, %27 : vector<6x48xf32>
    %cst_52 = arith.constant 0.000000e+00 : f32
    %29 = vector.broadcast %cst_52 : f32 to vector<6x48xf32>
    %30 = arith.cmpf ogt, %28, %29 : vector<6x48xf32>
    %c0_53 = arith.constant 0 : index
    %c0_54 = arith.constant 0 : index
    %31 = vector.load %arg6[%c0_53, %c0_54] : memref<1x1xf32, #tpu.memory_space<vmem>>, vector<1x1xf32>
    %32 = vector.broadcast %31 : vector<1x1xf32> to vector<6x48xf32>
    %33 = arith.mulf %32, %28 : vector<6x48xf32>
    %34 = arith.select %30, %28, %33 : vector<6x48xi1>, vector<6x48xf32>
    %c0_55 = arith.constant 0 : index
    %c0_56 = arith.constant 0 : index
    %c0_57 = arith.constant 0 : index
    %c0_58 = arith.constant 0 : index
    %35 = vector.load %arg7[%c0_55, %c0_56, %c0_57, %c0_58] : memref<1x1x6x48xf32, #tpu.memory_space<vmem>>, vector<1x1x6x48xf32>
    %36 = vector.shape_cast %35 : vector<1x1x6x48xf32> to vector<6x48xf32>
    %37 = vector.shape_cast %34 : vector<6x48xf32> to vector<1x1x6x48xf32>
    tpu.vector_store %arg7[%c0_55, %c0_56, %c0_57, %c0_58], %37 {strides = array<i32>} : memref<1x1x6x48xf32, #tpu.memory_space<vmem>>, vector<1x1x6x48xf32>,
    return
  }
  func.func @transform_0(%arg0: i32, %arg1: i32) -> (i32, i32, i32, i32, i32) {
    %c0_i32 = arith.constant 0 : i32
    %c0_i32_0 = arith.constant 0 : i32
    %c0_i32_1 = arith.constant 0 : i32
    %c0_i32_2 = arith.constant 0 : i32
    return %arg0, %arg1, %c0_i32, %c0_i32_0, %c0_i32_1 : i32, i32, i32, i32, i32
  }
  func.func @transform_1(%arg0: i32, %arg1: i32) -> (i32, i32) {
    %c0_i32 = arith.constant 0 : i32
    %c0_i32_0 = arith.constant 0 : i32
    %c0_i32_1 = arith.constant 0 : i32
    return %c0_i32, %c0_i32_0 : i32, i32
  }
  func.func @transform_2(%arg0: i32, %arg1: i32) -> (i32, i32) {
    %c0_i32 = arith.constant 0 : i32
    %c0_i32_0 = arith.constant 0 : i32
    %c0_i32_1 = arith.constant 0 : i32
    return %c0_i32, %c0_i32_0 : i32, i32
  }
  func.func @transform_3(%arg0: i32, %arg1: i32) -> (i32, i32) {
    %c0_i32 = arith.constant 0 : i32
    %c0_i32_0 = arith.constant 0 : i32
    %c0_i32_1 = arith.constant 0 : i32
    return %c0_i32, %c0_i32_0 : i32, i32
  }
  func.func @transform_4(%arg0: i32, %arg1: i32) -> (i32, i32) {
    %c0_i32 = arith.constant 0 : i32
    %c0_i32_0 = arith.constant 0 : i32
    %c0_i32_1 = arith.constant 0 : i32
    return %c0_i32, %c0_i32_0 : i32, i32
  }
  func.func @transform_5(%arg0: i32, %arg1: i32) -> (i32, i32, i32, i32) {
    %c0_i32 = arith.constant 0 : i32
    %c0_i32_0 = arith.constant 0 : i32
    %c0_i32_1 = arith.constant 0 : i32
    return %arg0, %arg1, %c0_i32, %c0_i32_0 : i32, i32, i32, i32
  }
}

module attributes {stable_mosaic.version = 11 : i64} {
  func.func @_conv_gemm_bn_prelu_kernel(%arg0: i32, %arg1: i32, %arg2: memref<1x1x8x6x6xf32, #tpu.memory_space<vmem>>, %arg3: memref<144x32xf32, #tpu.memory_space<vmem>>, %arg4: memref<1x32xf32, #tpu.memory_space<vmem>>, %arg5: memref<1x32xf32, #tpu.memory_space<vmem>>, %arg6: memref<1x1xf32, #tpu.memory_space<vmem>>, %arg7: memref<1x1x4x32xf32, #tpu.memory_space<vmem>>) attributes {dimension_semantics = [#tpu.dimension_semantics<parallel>, #tpu.dimension_semantics<parallel>], iteration_bounds = array<i64: 2, 1>, scalar_prefetch = 0 : i64, scratch_operands = 0 : i64, tpu.core_type = #tpu.core_type<tc>, window_params = [{transform_indices = @transform_0, window_bounds = array<i64: 1, 1, 8, 6, 6>}, {pipeline_mode = #tpu.pipeline_mode<synchronous>, transform_indices = @transform_1, window_bounds = array<i64: 144, 32>}, {pipeline_mode = #tpu.pipeline_mode<synchronous>, transform_indices = @transform_2, window_bounds = array<i64: 1, 32>}, {pipeline_mode = #tpu.pipeline_mode<synchronous>, transform_indices = @transform_3, window_bounds = array<i64: 1, 32>}, {pipeline_mode = #tpu.pipeline_mode<synchronous>, transform_indices = @transform_4, window_bounds = array<i64: 1, 1>}, {transform_indices = @transform_5, window_bounds = array<i64: 1, 1, 4, 32>}]} {
    %c0 = arith.constant 0 : index
    %c0_0 = arith.constant 0 : index
    %c0_1 = arith.constant 0 : index
    %c0_2 = arith.constant 0 : index
    %c0_3 = arith.constant 0 : index
    %0 = vector.load %arg2[%c0, %c0_0, %c0_1, %c0_2, %c0_3] : memref<1x1x8x6x6xf32, #tpu.memory_space<vmem>>, vector<1x1x1x4x6xf32>
    %1 = vector.shape_cast %0 : vector<1x1x1x4x6xf32> to vector<4x6xf32>
    %c0_4 = arith.constant 0 : index
    %c0_5 = arith.constant 0 : index
    %c1 = arith.constant 1 : index
    %c0_6 = arith.constant 0 : index
    %c0_7 = arith.constant 0 : index
    %2 = vector.load %arg2[%c0_4, %c0_5, %c1, %c0_6, %c0_7] : memref<1x1x8x6x6xf32, #tpu.memory_space<vmem>>, vector<1x1x1x4x6xf32>
    %3 = vector.shape_cast %2 : vector<1x1x1x4x6xf32> to vector<4x6xf32>
    %c0_8 = arith.constant 0 : index
    %c0_9 = arith.constant 0 : index
    %c2 = arith.constant 2 : index
    %c0_10 = arith.constant 0 : index
    %c0_11 = arith.constant 0 : index
    %4 = vector.load %arg2[%c0_8, %c0_9, %c2, %c0_10, %c0_11] : memref<1x1x8x6x6xf32, #tpu.memory_space<vmem>>, vector<1x1x1x4x6xf32>
    %5 = vector.shape_cast %4 : vector<1x1x1x4x6xf32> to vector<4x6xf32>
    %c0_12 = arith.constant 0 : index
    %c0_13 = arith.constant 0 : index
    %c3 = arith.constant 3 : index
    %c0_14 = arith.constant 0 : index
    %c0_15 = arith.constant 0 : index
    %6 = vector.load %arg2[%c0_12, %c0_13, %c3, %c0_14, %c0_15] : memref<1x1x8x6x6xf32, #tpu.memory_space<vmem>>, vector<1x1x1x4x6xf32>
    %7 = vector.shape_cast %6 : vector<1x1x1x4x6xf32> to vector<4x6xf32>
    %c0_16 = arith.constant 0 : index
    %c0_17 = arith.constant 0 : index
    %c4 = arith.constant 4 : index
    %c0_18 = arith.constant 0 : index
    %c0_19 = arith.constant 0 : index
    %8 = vector.load %arg2[%c0_16, %c0_17, %c4, %c0_18, %c0_19] : memref<1x1x8x6x6xf32, #tpu.memory_space<vmem>>, vector<1x1x1x4x6xf32>
    %9 = vector.shape_cast %8 : vector<1x1x1x4x6xf32> to vector<4x6xf32>
    %c0_20 = arith.constant 0 : index
    %c0_21 = arith.constant 0 : index
    %c5 = arith.constant 5 : index
    %c0_22 = arith.constant 0 : index
    %c0_23 = arith.constant 0 : index
    %10 = vector.load %arg2[%c0_20, %c0_21, %c5, %c0_22, %c0_23] : memref<1x1x8x6x6xf32, #tpu.memory_space<vmem>>, vector<1x1x1x4x6xf32>
    %11 = vector.shape_cast %10 : vector<1x1x1x4x6xf32> to vector<4x6xf32>
    %c0_24 = arith.constant 0 : index
    %c0_25 = arith.constant 0 : index
    %c6 = arith.constant 6 : index
    %c0_26 = arith.constant 0 : index
    %c0_27 = arith.constant 0 : index
    %12 = vector.load %arg2[%c0_24, %c0_25, %c6, %c0_26, %c0_27] : memref<1x1x8x6x6xf32, #tpu.memory_space<vmem>>, vector<1x1x1x4x6xf32>
    %13 = vector.shape_cast %12 : vector<1x1x1x4x6xf32> to vector<4x6xf32>
    %c0_28 = arith.constant 0 : index
    %c0_29 = arith.constant 0 : index
    %c7 = arith.constant 7 : index
    %c0_30 = arith.constant 0 : index
    %c0_31 = arith.constant 0 : index
    %14 = vector.load %arg2[%c0_28, %c0_29, %c7, %c0_30, %c0_31] : memref<1x1x8x6x6xf32, #tpu.memory_space<vmem>>, vector<1x1x1x4x6xf32>
    %15 = vector.shape_cast %14 : vector<1x1x1x4x6xf32> to vector<4x6xf32>
    %c0_32 = arith.constant 0 : index
    %c0_33 = arith.constant 0 : index
    %c0_34 = arith.constant 0 : index
    %c1_35 = arith.constant 1 : index
    %c0_36 = arith.constant 0 : index
    %16 = vector.load %arg2[%c0_32, %c0_33, %c0_34, %c1_35, %c0_36] : memref<1x1x8x6x6xf32, #tpu.memory_space<vmem>>, vector<1x1x1x4x6xf32>
    %17 = vector.shape_cast %16 : vector<1x1x1x4x6xf32> to vector<4x6xf32>
    %c0_37 = arith.constant 0 : index
    %c0_38 = arith.constant 0 : index
    %c1_39 = arith.constant 1 : index
    %c1_40 = arith.constant 1 : index
    %c0_41 = arith.constant 0 : index
    %18 = vector.load %arg2[%c0_37, %c0_38, %c1_39, %c1_40, %c0_41] : memref<1x1x8x6x6xf32, #tpu.memory_space<vmem>>, vector<1x1x1x4x6xf32>
    %19 = vector.shape_cast %18 : vector<1x1x1x4x6xf32> to vector<4x6xf32>
    %c0_42 = arith.constant 0 : index
    %c0_43 = arith.constant 0 : index
    %c2_44 = arith.constant 2 : index
    %c1_45 = arith.constant 1 : index
    %c0_46 = arith.constant 0 : index
    %20 = vector.load %arg2[%c0_42, %c0_43, %c2_44, %c1_45, %c0_46] : memref<1x1x8x6x6xf32, #tpu.memory_space<vmem>>, vector<1x1x1x4x6xf32>
    %21 = vector.shape_cast %20 : vector<1x1x1x4x6xf32> to vector<4x6xf32>
    %c0_47 = arith.constant 0 : index
    %c0_48 = arith.constant 0 : index
    %c3_49 = arith.constant 3 : index
    %c1_50 = arith.constant 1 : index
    %c0_51 = arith.constant 0 : index
    %22 = vector.load %arg2[%c0_47, %c0_48, %c3_49, %c1_50, %c0_51] : memref<1x1x8x6x6xf32, #tpu.memory_space<vmem>>, vector<1x1x1x4x6xf32>
    %23 = vector.shape_cast %22 : vector<1x1x1x4x6xf32> to vector<4x6xf32>
    %c0_52 = arith.constant 0 : index
    %c0_53 = arith.constant 0 : index
    %c4_54 = arith.constant 4 : index
    %c1_55 = arith.constant 1 : index
    %c0_56 = arith.constant 0 : index
    %24 = vector.load %arg2[%c0_52, %c0_53, %c4_54, %c1_55, %c0_56] : memref<1x1x8x6x6xf32, #tpu.memory_space<vmem>>, vector<1x1x1x4x6xf32>
    %25 = vector.shape_cast %24 : vector<1x1x1x4x6xf32> to vector<4x6xf32>
    %c0_57 = arith.constant 0 : index
    %c0_58 = arith.constant 0 : index
    %c5_59 = arith.constant 5 : index
    %c1_60 = arith.constant 1 : index
    %c0_61 = arith.constant 0 : index
    %26 = vector.load %arg2[%c0_57, %c0_58, %c5_59, %c1_60, %c0_61] : memref<1x1x8x6x6xf32, #tpu.memory_space<vmem>>, vector<1x1x1x4x6xf32>
    %27 = vector.shape_cast %26 : vector<1x1x1x4x6xf32> to vector<4x6xf32>
    %c0_62 = arith.constant 0 : index
    %c0_63 = arith.constant 0 : index
    %c6_64 = arith.constant 6 : index
    %c1_65 = arith.constant 1 : index
    %c0_66 = arith.constant 0 : index
    %28 = vector.load %arg2[%c0_62, %c0_63, %c6_64, %c1_65, %c0_66] : memref<1x1x8x6x6xf32, #tpu.memory_space<vmem>>, vector<1x1x1x4x6xf32>
    %29 = vector.shape_cast %28 : vector<1x1x1x4x6xf32> to vector<4x6xf32>
    %c0_67 = arith.constant 0 : index
    %c0_68 = arith.constant 0 : index
    %c7_69 = arith.constant 7 : index
    %c1_70 = arith.constant 1 : index
    %c0_71 = arith.constant 0 : index
    %30 = vector.load %arg2[%c0_67, %c0_68, %c7_69, %c1_70, %c0_71] : memref<1x1x8x6x6xf32, #tpu.memory_space<vmem>>, vector<1x1x1x4x6xf32>
    %31 = vector.shape_cast %30 : vector<1x1x1x4x6xf32> to vector<4x6xf32>
    %c0_72 = arith.constant 0 : index
    %c0_73 = arith.constant 0 : index
    %c0_74 = arith.constant 0 : index
    %c2_75 = arith.constant 2 : index
    %c0_76 = arith.constant 0 : index
    %32 = vector.load %arg2[%c0_72, %c0_73, %c0_74, %c2_75, %c0_76] : memref<1x1x8x6x6xf32, #tpu.memory_space<vmem>>, vector<1x1x1x4x6xf32>
    %33 = vector.shape_cast %32 : vector<1x1x1x4x6xf32> to vector<4x6xf32>
    %c0_77 = arith.constant 0 : index
    %c0_78 = arith.constant 0 : index
    %c1_79 = arith.constant 1 : index
    %c2_80 = arith.constant 2 : index
    %c0_81 = arith.constant 0 : index
    %34 = vector.load %arg2[%c0_77, %c0_78, %c1_79, %c2_80, %c0_81] : memref<1x1x8x6x6xf32, #tpu.memory_space<vmem>>, vector<1x1x1x4x6xf32>
    %35 = vector.shape_cast %34 : vector<1x1x1x4x6xf32> to vector<4x6xf32>
    %c0_82 = arith.constant 0 : index
    %c0_83 = arith.constant 0 : index
    %c2_84 = arith.constant 2 : index
    %c2_85 = arith.constant 2 : index
    %c0_86 = arith.constant 0 : index
    %36 = vector.load %arg2[%c0_82, %c0_83, %c2_84, %c2_85, %c0_86] : memref<1x1x8x6x6xf32, #tpu.memory_space<vmem>>, vector<1x1x1x4x6xf32>
    %37 = vector.shape_cast %36 : vector<1x1x1x4x6xf32> to vector<4x6xf32>
    %c0_87 = arith.constant 0 : index
    %c0_88 = arith.constant 0 : index
    %c3_89 = arith.constant 3 : index
    %c2_90 = arith.constant 2 : index
    %c0_91 = arith.constant 0 : index
    %38 = vector.load %arg2[%c0_87, %c0_88, %c3_89, %c2_90, %c0_91] : memref<1x1x8x6x6xf32, #tpu.memory_space<vmem>>, vector<1x1x1x4x6xf32>
    %39 = vector.shape_cast %38 : vector<1x1x1x4x6xf32> to vector<4x6xf32>
    %c0_92 = arith.constant 0 : index
    %c0_93 = arith.constant 0 : index
    %c4_94 = arith.constant 4 : index
    %c2_95 = arith.constant 2 : index
    %c0_96 = arith.constant 0 : index
    %40 = vector.load %arg2[%c0_92, %c0_93, %c4_94, %c2_95, %c0_96] : memref<1x1x8x6x6xf32, #tpu.memory_space<vmem>>, vector<1x1x1x4x6xf32>
    %41 = vector.shape_cast %40 : vector<1x1x1x4x6xf32> to vector<4x6xf32>
    %c0_97 = arith.constant 0 : index
    %c0_98 = arith.constant 0 : index
    %c5_99 = arith.constant 5 : index
    %c2_100 = arith.constant 2 : index
    %c0_101 = arith.constant 0 : index
    %42 = vector.load %arg2[%c0_97, %c0_98, %c5_99, %c2_100, %c0_101] : memref<1x1x8x6x6xf32, #tpu.memory_space<vmem>>, vector<1x1x1x4x6xf32>
    %43 = vector.shape_cast %42 : vector<1x1x1x4x6xf32> to vector<4x6xf32>
    %c0_102 = arith.constant 0 : index
    %c0_103 = arith.constant 0 : index
    %c6_104 = arith.constant 6 : index
    %c2_105 = arith.constant 2 : index
    %c0_106 = arith.constant 0 : index
    %44 = vector.load %arg2[%c0_102, %c0_103, %c6_104, %c2_105, %c0_106] : memref<1x1x8x6x6xf32, #tpu.memory_space<vmem>>, vector<1x1x1x4x6xf32>
    %45 = vector.shape_cast %44 : vector<1x1x1x4x6xf32> to vector<4x6xf32>
    %c0_107 = arith.constant 0 : index
    %c0_108 = arith.constant 0 : index
    %c7_109 = arith.constant 7 : index
    %c2_110 = arith.constant 2 : index
    %c0_111 = arith.constant 0 : index
    %46 = vector.load %arg2[%c0_107, %c0_108, %c7_109, %c2_110, %c0_111] : memref<1x1x8x6x6xf32, #tpu.memory_space<vmem>>, vector<1x1x1x4x6xf32>
    %47 = vector.shape_cast %46 : vector<1x1x1x4x6xf32> to vector<4x6xf32>
    %48 = tpu.concatenate %1, %3, %5, %7, %9, %11, %13, %15, %17, %19, %21, %23, %25, %27, %29, %31 in 1 : vector<4x6xf32>, vector<4x6xf32>, vector<4x6xf32>, vector<4x6xf32>, vector<4x6xf32>, vector<4x6xf32>, vector<4x6xf32>, vector<4x6xf32>, vector<4x6xf32>, vector<4x6xf32>, vector<4x6xf32>, vector<4x6xf32>, vector<4x6xf32>, vector<4x6xf32>, vector<4x6xf32>, vector<4x6xf32> -> vector<4x96xf32>
    %49 = tpu.concatenate %33, %35, %37, %39, %41, %43, %45, %47 in 1 : vector<4x6xf32>, vector<4x6xf32>, vector<4x6xf32>, vector<4x6xf32>, vector<4x6xf32>, vector<4x6xf32>, vector<4x6xf32>, vector<4x6xf32> -> vector<4x48xf32>
    %50 = tpu.concatenate %48, %49 in 1 : vector<4x96xf32>, vector<4x48xf32> -> vector<4x144xf32>
    %c0_112 = arith.constant 0 : index
    %c0_113 = arith.constant 0 : index
    %51 = vector.load %arg3[%c0_112, %c0_113] : memref<144x32xf32, #tpu.memory_space<vmem>>, vector<144x32xf32>
    %cst = arith.constant dense<0.000000e+00> : vector<4x32xf32>
    %52 = tpu.matmul %50, %51, %cst {dimension_numbers = #tpu.dot_dimension_numbers<[1], [0], [0], [1], [0, 0, 1, 1], [], []>} : vector<4x144xf32>, vector<144x32xf32>, vector<4x32xf32> -> vector<4x32xf32>
    %c0_114 = arith.constant 0 : index
    %c0_115 = arith.constant 0 : index
    %53 = vector.load %arg4[%c0_114, %c0_115] : memref<1x32xf32, #tpu.memory_space<vmem>>, vector<1x32xf32>
    %54 = vector.broadcast %53 : vector<1x32xf32> to vector<4x32xf32>
    %55 = arith.mulf %52, %54 : vector<4x32xf32>
    %c0_116 = arith.constant 0 : index
    %c0_117 = arith.constant 0 : index
    %56 = vector.load %arg5[%c0_116, %c0_117] : memref<1x32xf32, #tpu.memory_space<vmem>>, vector<1x32xf32>
    %57 = vector.broadcast %56 : vector<1x32xf32> to vector<4x32xf32>
    %58 = arith.addf %55, %57 : vector<4x32xf32>
    %cst_118 = arith.constant 0.000000e+00 : f32
    %59 = vector.broadcast %cst_118 : f32 to vector<4x32xf32>
    %60 = arith.cmpf ogt, %58, %59 : vector<4x32xf32>
    %c0_119 = arith.constant 0 : index
    %c0_120 = arith.constant 0 : index
    %61 = vector.load %arg6[%c0_119, %c0_120] : memref<1x1xf32, #tpu.memory_space<vmem>>, vector<1x1xf32>
    %62 = vector.broadcast %61 : vector<1x1xf32> to vector<4x32xf32>
    %63 = arith.mulf %62, %58 : vector<4x32xf32>
    %64 = arith.select %60, %58, %63 : vector<4x32xi1>, vector<4x32xf32>
    %c0_121 = arith.constant 0 : index
    %c0_122 = arith.constant 0 : index
    %c0_123 = arith.constant 0 : index
    %c0_124 = arith.constant 0 : index
    %65 = vector.load %arg7[%c0_121, %c0_122, %c0_123, %c0_124] : memref<1x1x4x32xf32, #tpu.memory_space<vmem>>, vector<1x1x4x32xf32>
    %66 = vector.shape_cast %65 : vector<1x1x4x32xf32> to vector<4x32xf32>
    %67 = vector.shape_cast %64 : vector<4x32xf32> to vector<1x1x4x32xf32>
    tpu.vector_store %arg7[%c0_121, %c0_122, %c0_123, %c0_124], %67 {strides = array<i32>} : memref<1x1x4x32xf32, #tpu.memory_space<vmem>>, vector<1x1x4x32xf32>,
    return
  }
  func.func @transform_0(%arg0: i32, %arg1: i32) -> (i32, i32, i32, i32, i32) {
    %c0_i32 = arith.constant 0 : i32
    %c0_i32_0 = arith.constant 0 : i32
    %c0_i32_1 = arith.constant 0 : i32
    %c0_i32_2 = arith.constant 0 : i32
    return %arg0, %arg1, %c0_i32, %c0_i32_0, %c0_i32_1 : i32, i32, i32, i32, i32
  }
  func.func @transform_1(%arg0: i32, %arg1: i32) -> (i32, i32) {
    %c0_i32 = arith.constant 0 : i32
    %c0_i32_0 = arith.constant 0 : i32
    %c0_i32_1 = arith.constant 0 : i32
    return %c0_i32, %c0_i32_0 : i32, i32
  }
  func.func @transform_2(%arg0: i32, %arg1: i32) -> (i32, i32) {
    %c0_i32 = arith.constant 0 : i32
    %c0_i32_0 = arith.constant 0 : i32
    %c0_i32_1 = arith.constant 0 : i32
    return %c0_i32, %c0_i32_0 : i32, i32
  }
  func.func @transform_3(%arg0: i32, %arg1: i32) -> (i32, i32) {
    %c0_i32 = arith.constant 0 : i32
    %c0_i32_0 = arith.constant 0 : i32
    %c0_i32_1 = arith.constant 0 : i32
    return %c0_i32, %c0_i32_0 : i32, i32
  }
  func.func @transform_4(%arg0: i32, %arg1: i32) -> (i32, i32) {
    %c0_i32 = arith.constant 0 : i32
    %c0_i32_0 = arith.constant 0 : i32
    %c0_i32_1 = arith.constant 0 : i32
    return %c0_i32, %c0_i32_0 : i32, i32
  }
  func.func @transform_5(%arg0: i32, %arg1: i32) -> (i32, i32, i32, i32) {
    %c0_i32 = arith.constant 0 : i32
    %c0_i32_0 = arith.constant 0 : i32
    %c0_i32_1 = arith.constant 0 : i32
    return %arg0, %arg1, %c0_i32, %c0_i32_0 : i32, i32, i32, i32
  }
}

</mosaic_0001>

<bundles_post_ra>
// kernel: _lambda_.2
= control target key start
LH: loop header
LB: loop body
LE: loop exit
PB: predicated region body
PF: predicated region fallthrough
CT: control target
= control target key end

     0   :  { %s701_s20 = smov 0   ;;  %s703_s21 = smov 0   ;;  %s786_s0 = inlined_call_operand.vmem [shape: f32[2,1,4,8,8], index: 0, kind: input, shape index: {}]   ;;  %s787_s1 = inlined_call_operand.vmem [shape: f32[80,48], index: 1, kind: input, shape index: {}]   ;;  %s788_s2 = inlined_call_operand.vmem [shape: f32[1,48], index: 2, kind: input, shape index: {}]   ;;  %s789_s3 = inlined_call_operand.vmem [shape: f32[1,48], index: 3, kind: input, shape index: {}]   ;;  %s790_s4 = inlined_call_operand.<no memory space> [shape: f32[1,1], index: 4, kind: input, shape index: {}]   ;;  %s791_s5 = inlined_call_operand.vmem [shape: f32[2,1,6,48], index: 5, kind: output, shape index: {}]  }
   0x1   :  { %v10_v0 = vstv %s790_s4  ;;  %s705_s22 = smov 0  }
   0x2   :  { %11 = vst [vmem:[#allocation2] sm:$0x1] %v10_v0 }
   0x3 LB: > { %s29_s4 = sadd.s32 1, %s649_s21  ;;  %p525_p0 = scmp.ge.s32.totalorder %s653_s22, 1  ;;  %s653_s22 = sphi %s705_s22, %s17_s22   ;;  %s649_s21 = sphi %s703_s21, %s793_s21   ;;  %s645_s20 = sphi %s701_s20, %s792_s20  }
   0x4   : > { %p31_p1 = scmp.ge.s32.totalorder %s29_s4, 2  ;;  %p209_p2 = scmp.lt.s32.totalorder %s653_s22, 3 }
   0x6   : > { %s795_s4 = smov (%p31_p1, %s29_s4), 0  ;;  %p210_p3 = pnand %p525_p0, %p209_p2 }
   0x7   : > { %p243_p4 = scmp.lt.s32.totalorder (!%p210_p3), %s645_s20, 1  ;;  %v326_v1 = vld [vmem:[%s787_s1] sm:$0xff] (!%p210_p3)  ;;  %v327_v2 = vld [vmem:[%s787_s1 + $0x8] sm:$0xff] (!%p210_p3)  ;;  %v655_v3 = vmov (!%p210_p3), 0.0|0.0   ;;  %v328_v5 = vld [vmem:[%s787_s1 + $0x10] sm:$0xff] (!%p210_p3)  ;;  %s656_s14 = smov (!%p210_p3), 8  }
   0x8   : > { %213 = sbr.rel (%p210_p3) target bundleno = 371 (0x173), region = 40  ;;  %577 = vmatprep.subr.bf16.mxu0 (!%p210_p3), %v655_v3  ;;  %v578_v4 = vpack.c.bf16 (!%p210_p3), %v327_v2, %v326_v1  ;;  %v329_v6 = vld [vmem:[%s787_s1 + $0x18] sm:$0xff] (!%p210_p3)  ;;  %v330_v8 = vld [vmem:[%s787_s1 + $0x20] sm:$0xff] (!%p210_p3)  ;;  %v331_v9 = vld [vmem:[%s787_s1 + $0x28] sm:$0xff] (!%p210_p3)  ;;  %s657_s15 = smov (!%p210_p3), 24   ;;  %vm660_vm0 = vmmov (!%p210_p3), 0  }
   0x9   : > { %v581_v7 = vpack.c.bf16 (!%p210_p3), %v329_v6, %v328_v5  ;;  %v584_v14 = vpack.c.bf16 (!%p210_p3), %v331_v9, %v330_v8  ;;  %v332_v15 = vld [vmem:[%s787_s1 + $0x30] sm:$0xff] (!%p210_p3)  ;;  %v333_v16 = vld [vmem:[%s787_s1 + $0x38] sm:$0xff] (!%p210_p3)  ;;  %s658_s23 = smov (!%p210_p3), 16   ;;  %s659_s24 = smov (!%p210_p3), 32   ;;  %v661_v20 = vmov (!%p210_p3), 0.0   ;;  %v334_v21 = vld [vmem:[%s787_s1 + $0x40] sm:$0xff] (!%p210_p3) }
   0xa   : > { %579 = vmatpush3.bf16.msra.mxu0 (!%p210_p3), %v578_v4  ;;  %v587_v19 = vpack.c.bf16 (!%p210_p3), %v333_v16, %v332_v15  ;;  %574 = vmatprep.mubr.msk.f32.mxu0 (!%p210_p3), %vm660_vm0, %v661_v20  ;;  %v335_v22 = vld [vmem:[%s787_s1 + $0x48] sm:$0xff] (!%p210_p3)  ;;  %v662_v23 = vmov (!%p210_p3), 0   ;;  %s663_s29 = smov (!%p210_p3), 40   ;;  %s664_s30 = smov (!%p210_p3), 48   ;;  %v539_v28 = vld [vmem:[#allocation2] ss:$0 sm:$0xff] (!%p210_p3) }
   0xb   : > { %580 = vmatprep.subr.bf16.mxu0 (!%p210_p3), %v655_v3  ;;  %629 = vset.pattern.permute.xlu1 (!%p210_p3), %v662_v23  ;;  %v590_v26 = vpack.c.bf16 (!%p210_p3), %v335_v22, %v334_v21  ;;  %s666_s7 = smov (!%p210_p3), 64   ;;  %s667_s8 = smov (!%p210_p3), 72   ;;  %vm308_vm1 = vcmask (!%p210_p3), 64512   ;;  %vm310_vm2 = vcmask (!%p210_p3), 130048   ;;  %vm312_vm3 = vcmask (!%p210_p3), 195584  }
   0xc   : > { %630 = vset.pattern.permute.xlu0 (!%p210_p3), %v662_v23  ;;  %vm314_vm4 = vcmask (!%p210_p3), 261120   ;;  %vm316_vm5 = vcmask (!%p210_p3), 326656   ;;  %vm318_vm6 = vcmask (!%p210_p3), 392192   ;;  %vm320_vm7 = vcmask (!%p210_p3), 457728   ;;  %v537_v48 = vld [vmem:[%s788_s2] ss:$0 sm:$0xff] (!%p210_p3) }
   0xd   : > { %vm322_vm8 = vcmask (!%p210_p3), 523264   ;;  %vm324_vm9 = vcmask (!%p210_p3), 588800   ;;  %vm336_vm10 = vcmask (!%p210_p3), 654336   ;;  %v538_v50 = vld [vmem:[%s789_s3] ss:$0 sm:$0xff] (!%p210_p3)  ;;  %vm439_vm12 = vcmask (!%p210_p3), 390144  }
   0xe   : > { %582 = vmatpush3.bf16.msra.mxu0 (!%p210_p3), %v581_v7 }
   0xf   : > { %s797_s20 = smov (!%p243_p4, %s645_s20), 1  ;;  %583 = vmatprep.subr.bf16.mxu0 %v655_v3 }
  0x10   : > { %s542_s6 = sshll.u32 %s797_s20, 5  ;;  %s528_s13 = sshll.u32 %s797_s20, 3 }
  0x11   : > { %s737_s9 = scalar_lea.vmem %s786_s0, %s542_s6  ;;  %s665_s6 = smov 56  }
  0x12   : > { %v529_v10 = vld [vmem:[%s737_s9 + $0x8] sm:$0x3f]  ;;  %v531_v11 = vld [vmem:[%s737_s9 + $0x18] sm:$0x3f]  ;;  %v530_v12 = vld [vmem:[%s737_s9 + $0x10] sm:$0x3f]  ;;  %585 = vmatpush3.bf16.msra.mxu0 %v584_v14  ;;  %s258_s16 = scalar_lea.vmem %s791_s5, %s528_s13 }
  0x13   : > { %273 = vrot.lane.b32.xlu0 %v529_v10, %s656_s14  ;;  %281 = vrot.lane.b32.xlu1 %v531_v11, %s657_s15  ;;  %v266_v13 = vld [vmem:[%s737_s9 + $0x1] sm:$0x3f]  ;;  %v532_v17 = vld [vmem:[%s737_s9 + $0x9] sm:$0x3f] }
  0x14   : > { %v533_v18 = vld [vmem:[%s737_s9 + $0x11] sm:$0x3f]  ;;  %586 = vmatprep.subr.bf16.mxu0 %v655_v3  ;;  %v534_v24 = vld [vmem:[%s737_s9 + $0x19] sm:$0x3f]  ;;  %v270_v25 = vld [vmem:[%s737_s9 + $0x2] sm:$0x3f] }
  0x15   : > { %v535_v27 = vld [vmem:[%s737_s9 + $0xa] sm:$0x3f]  ;;  %v259_v31 = vld [vmem:[%s737_s9] sm:$0x3f] }
  0x16   : > { %588 = vmatpush3.bf16.msra.mxu0 %v587_v19 }
  0x17   : > { %277 = vrot.lane.b32.xlu0 %v530_v12, %s658_s23  ;;  %285 = vrot.lane.b32.xlu1 %v266_v13, %s659_s24 }
  0x18   : > { %589 = vmatprep.subr.bf16.mxu0 %v655_v3 }
  0x1a   : > { %591 = vmatpush3.bf16.msra.mxu0 %v590_v26 }
  0x1b   : > { %289 = vrot.lane.b32.xlu0 %v532_v17, %s663_s29  ;;  %293 = vrot.lane.b32.xlu1 %v533_v18, %s664_s30 }
  0x1f   : > { %297 = vrot.lane.b32.xlu0 %v534_v24, %s665_s6  ;;  %301 = vrot.lane.b32.xlu1 %v270_v25, %s666_s7 }
  0x23   : > { %305 = vrot.lane.b32.xlu0 %v535_v27, %s667_s8  ;;  %434 = vperm.xlu1 %629, %v539_v28  }
  0x85   : > { %v274_v29 = vpop.permute.xlu0 %273  ;;  %v282_v30 = vpop.permute.xlu1 %281 }
  0x86   : > { %v309_v32 = vsel %vm308_vm1, %v259_v31, %v274_v29 }
  0x89   : > { %v278_v33 = vpop.permute.xlu0 %277  ;;  %v286_v34 = vpop.permute.xlu1 %285 }
  0x8a   : > { %v311_v35 = vsel %vm310_vm2, %v309_v32, %v278_v33 }
  0x8b   : > { %v313_v36 = vsel %vm312_vm3, %v311_v35, %v282_v30 }
  0x8c   : > { %v315_v37 = vsel %vm314_vm4, %v313_v36, %v286_v34 }
  0x8d   : > { %v290_v38 = vpop.permute.xlu0 %289  ;;  %v294_v39 = vpop.permute.xlu1 %293 }
  0x8e   : > { %v317_v40 = vsel %vm316_vm5, %v315_v37, %v290_v38 }
  0x8f   : > { %v319_v41 = vsel %vm318_vm6, %v317_v40, %v294_v39 }
  0x91   : > { %v298_v42 = vpop.permute.xlu0 %297  ;;  %v302_v44 = vpop.permute.xlu1 %301 }
  0x92   : > { %v321_v43 = vsel %vm320_vm7, %v319_v41, %v298_v42 }
  0x93   : > { %v323_v45 = vsel %vm322_vm8, %v321_v43, %v302_v44 }
  0x95   : > { %v306_v46 = vpop.permute.xlu0 %305 }
  0x96   : > { %v325_v47 = vsel %vm324_vm9, %v323_v45, %v306_v46 }
  0x97   : > { %575 = vmatmul.mubr.msk.f32.vlgmr.msra.gmra.mrb[0].mxu0 %vm336_vm10, %v325_v47 }
  0xa2   : > { %v435_v53 = vpop.permute.xlu1 %434 }
 0x16a   : > { %v406_v49 = vpop.f32.mrb[0].mxu0 }
 0x16b   : > { %v417_v51 = vmul.f32 %v537_v48, %v406_v49  ;;  %v576_v52 = vpop.f32.mrb[1].mxu0 }
 0x16d   : > { %v425_v54 = vadd.f32 %v538_v50, %v417_v51 }
 0x16f   : > { %vm426_vm11 = vcmp.gt.f32.partialorder %v425_v54, 0.0  ;;  %v437_v55 = vmul.f32 %v435_v53, %v425_v54 }
 0x171   : > { %v438_v56 = vsel %vm426_vm11, %v425_v54, %v437_v55 }
 0x172   : > { %440 = vst.msk [vmem:[%s258_s16] sm:$0x3f] %vm439_vm12, %v438_v56 }
 0x173 PF: > { %s17_s22 = sadd.s32 1, %s653_s22   ;;  %s792_s20 = smov %s649_s21 }
 0x174   : > { %p14_p5 = scmp.ge.s32.totalorder %s17_s22, 4   ;;  %s793_s21 = smov %s795_s4 }
 0x176   :  { %16 = sbr.rel (!%p14_p5) target bundleno = 3 (0x3), region = 73 }

// kernel: _lambda_.3
= control target key start
LH: loop header
LB: loop body
LE: loop exit
PB: predicated region body
PF: predicated region fallthrough
CT: control target
= control target key end

     0   :  { %s805_s20 = smov 0   ;;  %s807_s21 = smov 0   ;;  %s959_s0 = inlined_call_operand.vmem [shape: f32[2,1,8,6,6], index: 0, kind: input, shape index: {}]   ;;  %s960_s1 = inlined_call_operand.vmem [shape: f32[144,32], index: 1, kind: input, shape index: {}]   ;;  %s961_s2 = inlined_call_operand.vmem [shape: f32[1,32], index: 2, kind: input, shape index: {}]   ;;  %s962_s3 = inlined_call_operand.vmem [shape: f32[1,32], index: 3, kind: input, shape index: {}]   ;;  %s963_s4 = inlined_call_operand.<no memory space> [shape: f32[1,1], index: 4, kind: input, shape index: {}]   ;;  %s964_s5 = inlined_call_operand.vmem [shape: f32[2,1,4,32], index: 5, kind: output, shape index: {}]  }
   0x1   :  { %v10_v0 = vstv %s963_s4  ;;  %s809_s22 = smov 0  }
   0x2   :  { %11 = vst [vmem:[#allocation2] sm:$0x1] %v10_v0 }
   0x3 LB: > { %s29_s4 = sadd.s32 1, %s748_s21  ;;  %p627_p0 = scmp.ge.s32.totalorder %s752_s22, 1  ;;  %s752_s22 = sphi %s809_s22, %s17_s22   ;;  %s748_s21 = sphi %s807_s21, %s966_s21   ;;  %s744_s20 = sphi %s805_s20, %s965_s20  }
   0x4   : > { %p31_p1 = scmp.ge.s32.totalorder %s29_s4, 2  ;;  %p209_p2 = scmp.lt.s32.totalorder %s752_s22, 3 }
   0x6   : > { %s968_s4 = smov (%p31_p1, %s29_s4), 0  ;;  %p210_p3 = pnand %p627_p0, %p209_p2 }
   0x7   : > { %p243_p4 = scmp.lt.s32.totalorder (!%p210_p3), %s744_s20, 1  ;;  %s754_s27 = smov (!%p210_p3), 6   ;;  %v421_v7 = vld [vmem:[%s960_s1] sm:$0xff] (!%p210_p3)  ;;  %v760_v10 = vmov (!%p210_p3), 0.0|0.0   ;;  %v422_v11 = vld [vmem:[%s960_s1 + $0x8] sm:$0xff] (!%p210_p3)  ;;  %v423_v13 = vld [vmem:[%s960_s1 + $0x10] sm:$0xff] (!%p210_p3) }
   0x8   : > { %213 = sbr.rel (%p210_p3) target bundleno = 483 (0x1e3), region = 40  ;;  %s755_s28 = smov (!%p210_p3), 18   ;;  %659 = vmatprep.subr.bf16.mxu0 (!%p210_p3), %v760_v10  ;;  %v660_v12 = vpack.c.bf16 (!%p210_p3), %v422_v11, %v421_v7  ;;  %v424_v14 = vld [vmem:[%s960_s1 + $0x18] sm:$0xff] (!%p210_p3)  ;;  %v425_v18 = vld [vmem:[%s960_s1 + $0x20] sm:$0xff] (!%p210_p3)  ;;  %v426_v19 = vld [vmem:[%s960_s1 + $0x28] sm:$0xff] (!%p210_p3)  ;;  %vm350_vm0 = vcmask (!%p210_p3), 48128  }
   0x9   : > { %s756_s29 = smov (!%p210_p3), 12   ;;  %s757_s30 = smov (!%p210_p3), 24   ;;  %v663_v17 = vpack.c.bf16 (!%p210_p3), %v424_v14, %v423_v13  ;;  %v666_v22 = vpack.c.bf16 (!%p210_p3), %v426_v19, %v425_v18  ;;  %v427_v23 = vld [vmem:[%s960_s1 + $0x30] sm:$0xff] (!%p210_p3)  ;;  %v428_v24 = vld [vmem:[%s960_s1 + $0x38] sm:$0xff] (!%p210_p3)  ;;  %v429_v28 = vld [vmem:[%s960_s1 + $0x40] sm:$0xff] (!%p210_p3)  ;;  %vm352_vm1 = vcmask (!%p210_p3), 97280  }
   0xa   : > { %s758_s6 = smov (!%p210_p3), 30   ;;  %s759_s7 = smov (!%p210_p3), 36   ;;  %661 = vmatpush1.bf16.msra.mxu0 (!%p210_p3), %v660_v12  ;;  %v669_v27 = vpack.c.bf16 (!%p210_p3), %v428_v24, %v427_v23  ;;  %v430_v29 = vld [vmem:[%s960_s1 + $0x48] sm:$0xff] (!%p210_p3)  ;;  %v431_v33 = vld [vmem:[%s960_s1 + $0x50] sm:$0xff] (!%p210_p3)  ;;  %v432_v34 = vld [vmem:[%s960_s1 + $0x58] sm:$0xff] (!%p210_p3)  ;;  %vm354_vm2 = vcmask (!%p210_p3), 146432  }
   0xb   : > { %s761_s12 = smov (!%p210_p3), 42   ;;  %662 = vmatprep.subr.bf16.mxu0 (!%p210_p3), %v760_v10  ;;  %v672_v32 = vpack.c.bf16 (!%p210_p3), %v430_v29, %v429_v28  ;;  %s762_s9 = smov (!%p210_p3), 48   ;;  %v675_v37 = vpack.c.bf16 (!%p210_p3), %v432_v34, %v431_v33  ;;  %v433_v38 = vld [vmem:[%s960_s1 + $0x60] sm:$0xff] (!%p210_p3)  ;;  %v434_v39 = vld [vmem:[%s960_s1 + $0x68] sm:$0xff] (!%p210_p3)  ;;  %v435_v43 = vld [vmem:[%s960_s1 + $0x70] sm:$0xff] (!%p210_p3)  ;;  %v770_v55 = vmov (!%p210_p3), 0  }
   0xc   : > { %s764_s18 = smov (!%p210_p3), 60   ;;  %s765_s19 = smov (!%p210_p3), 66   ;;  %v678_v42 = vpack.c.bf16 (!%p210_p3), %v434_v39, %v433_v38  ;;  %v436_v44 = vld [vmem:[%s960_s1 + $0x78] sm:$0xff] (!%p210_p3)  ;;  %v437_v48 = vld [vmem:[%s960_s1 + $0x80] sm:$0xff] (!%p210_p3)  ;;  %v438_v49 = vld [vmem:[%s960_s1 + $0x88] sm:$0xff] (!%p210_p3)  ;;  %728 = vset.pattern.permute.xlu1 (!%p210_p3), %v770_v55  ;;  %729 = vset.pattern.permute.xlu0 (!%p210_p3), %v770_v55  ;;  %vm356_vm3 = vcmask (!%p210_p3), 195584  }
   0xd   : > { %v681_v47 = vpack.c.bf16 (!%p210_p3), %v436_v44, %v435_v43  ;;  %s769_s10 = smov (!%p210_p3), 90   ;;  %v684_v50 = vpack.c.bf16 (!%p210_p3), %v438_v49, %v437_v48  ;;  %v655_v54 = vld [vmem:[#allocation2] ss:$0 sm:$0xff] (!%p210_p3)  ;;  %vm358_vm4 = vcmask (!%p210_p3), 244736   ;;  %vm360_vm5 = vcmask (!%p210_p3), 293888   ;;  %s771_s11 = smov (!%p210_p3), 96  }
   0xe   : > { %664 = vmatpush1.bf16.msra.mxu0 (!%p210_p3), %v663_v17  ;;  %vm362_vm6 = vcmask (!%p210_p3), 343040   ;;  %vm364_vm7 = vcmask (!%p210_p3), 392192   ;;  %vm366_vm8 = vcmask (!%p210_p3), 441344   ;;  %vm368_vm9 = vcmask (!%p210_p3), 490496   ;;  %v654_v39 = vld [vmem:[%s962_s3] ss:$0 sm:$0xff] (!%p210_p3) }
   0xf   : > { %s970_s20 = smov (!%p243_p4, %s744_s20), 1  ;;  %665 = vmatprep.subr.bf16.mxu0 %v760_v10  ;;  %vm370_vm10 = vcmask 539648   ;;  %vm372_vm11 = vcmask 588800   ;;  %vm374_vm12 = vcmask 637952   ;;  %vm376_vm13 = vcmask 687104  }
  0x10   : > { %s658_s23 = sshll.u32 %s970_s20, 6  ;;  %vm378_vm14 = vcmask 736256   ;;  %vm439_vm15 = vcmask 130048   ;;  %s630_s15 = sshll.u32 %s970_s20, 2 }
  0x11   : > { %s829_s26 = scalar_lea.vmem %s959_s0, %s658_s23 }
  0x12   : > { %v645_v1 = vld [vmem:[%s829_s26 + $0xa] sm:$0xf]  ;;  %v647_v2 = vld [vmem:[%s829_s26 + $0x1a] sm:$0xf]  ;;  %v646_v3 = vld [vmem:[%s829_s26 + $0x12] sm:$0xf]  ;;  %667 = vmatpush1.bf16.msra.mxu0 %v666_v22 }
  0x13   : > { %381 = vrot.lane.b32.xlu0 %v645_v1, %s754_s27  ;;  %389 = vrot.lane.b32.xlu1 %v647_v2, %s755_s28  ;;  %v648_v4 = vld [vmem:[%s829_s26 + $0x22] sm:$0xf]  ;;  %v649_v5 = vld [vmem:[%s829_s26 + $0x2a] sm:$0xf] }
  0x14   : > { %v650_v6 = vld [vmem:[%s829_s26 + $0x32] sm:$0xf]  ;;  %v651_v8 = vld [vmem:[%s829_s26 + $0x3a] sm:$0xf]  ;;  %v631_v9 = vld [vmem:[%s829_s26 + $0x8] sm:$0xf]  ;;  %668 = vmatprep.subr.bf16.mxu0 %v760_v10 }
  0x15   : > { %v632_v15 = vld [vmem:[%s829_s26 + $0x10] sm:$0xf]  ;;  %v633_v16 = vld [vmem:[%s829_s26 + $0x18] sm:$0xf]  ;;  %v634_v20 = vld [vmem:[%s829_s26 + $0x20] sm:$0xf] }
  0x16   : > { %v635_v21 = vld [vmem:[%s829_s26 + $0x28] sm:$0xf]  ;;  %v636_v25 = vld [vmem:[%s829_s26 + $0x30] sm:$0xf]  ;;  %v637_v26 = vld [vmem:[%s829_s26 + $0x38] sm:$0xf]  ;;  %670 = vmatpush1.bf16.msra.mxu0 %v669_v27 }
  0x17   : > { %385 = vrot.lane.b32.xlu0 %v646_v3, %s756_s29  ;;  %393 = vrot.lane.b32.xlu1 %v648_v4, %s757_s30  ;;  %v274_v30 = vld [vmem:[%s829_s26 + $0x1] sm:$0xf]  ;;  %v638_v31 = vld [vmem:[%s829_s26 + $0x9] sm:$0xf] }
  0x18   : > { %671 = vmatprep.subr.bf16.mxu0 %v760_v10  ;;  %v639_v35 = vld [vmem:[%s829_s26 + $0x11] sm:$0xf]  ;;  %v640_v36 = vld [vmem:[%s829_s26 + $0x19] sm:$0xf]  ;;  %v641_v40 = vld [vmem:[%s829_s26 + $0x21] sm:$0xf] }
  0x19   : > { %v642_v41 = vld [vmem:[%s829_s26 + $0x29] sm:$0xf]  ;;  %v643_v45 = vld [vmem:[%s829_s26 + $0x31] sm:$0xf]  ;;  %v644_v46 = vld [vmem:[%s829_s26 + $0x39] sm:$0xf] }
  0x1a   : > { %673 = vmatpush1.bf16.msra.mxu0 %v672_v32  ;;  %v282_v53 = vld [vmem:[%s829_s26 + $0x2] sm:$0xf] }
  0x1b   : > { %397 = vrot.lane.b32.xlu0 %v649_v5, %s758_s6  ;;  %401 = vrot.lane.b32.xlu1 %v650_v6, %s759_s7  ;;  %v259_v1 = vld [vmem:[%s829_s26] sm:$0xf] }
  0x1c   : > { %674 = vmatprep.subr.bf16.mxu0 %v760_v10 }
  0x1e   : > { %676 = vmatpush1.bf16.msra.mxu0 %v675_v37  ;;  %v653_v37 = vld [vmem:[%s961_s2] ss:$0 sm:$0xff] }
  0x1f   : > { %405 = vrot.lane.b32.xlu0 %v651_v8, %s761_s12  ;;  %291 = vrot.lane.b32.xlu1 %v631_v9, %s754_s27 }
  0x20   : > { %677 = vmatprep.subr.bf16.mxu0 %v760_v10 }
  0x22   : > { %679 = vmatpush1.bf16.msra.mxu0 %v678_v42 }
  0x23   : > { %295 = vrot.lane.b32.xlu0 %v632_v15, %s756_s29  ;;  %299 = vrot.lane.b32.xlu1 %v633_v16, %s755_s28  ;;  %s766_s28 = smov 72   ;;  %s767_s29 = smov 78  }
  0x24   : > { %680 = vmatprep.subr.bf16.mxu0 %v760_v10 }
  0x26   : > { %682 = vmatpush1.bf16.msra.mxu0 %v681_v47 }
  0x27   : > { %303 = vrot.lane.b32.xlu0 %v634_v20, %s757_s30  ;;  %307 = vrot.lane.b32.xlu1 %v635_v21, %s758_s6 }
  0x28   : > { %683 = vmatprep.subr.bf16.mxu0 %v760_v10 }
  0x2a   : > { %685 = vmatpush1.bf16.msra.mxu0 %v684_v50 }
  0x2b   : > { %311 = vrot.lane.b32.xlu0 %v636_v25, %s759_s7  ;;  %315 = vrot.lane.b32.xlu1 %v637_v26, %s761_s12  ;;  %s763_s7 = smov 54  }
  0x2f   : > { %319 = vrot.lane.b32.xlu0 %v274_v30, %s762_s9  ;;  %323 = vrot.lane.b32.xlu1 %v638_v31, %s763_s7  ;;  %s768_s7 = smov 84  }
  0x33   : > { %327 = vrot.lane.b32.xlu0 %v639_v35, %s764_s18  ;;  %331 = vrot.lane.b32.xlu1 %v640_v36, %s765_s19  ;;  %s258_s18 = scalar_lea.vmem %s964_s5, %s630_s15 }
  0x37   : > { %335 = vrot.lane.b32.xlu0 %v641_v40, %s766_s28  ;;  %339 = vrot.lane.b32.xlu1 %v642_v41, %s767_s29 }
  0x3b   : > { %343 = vrot.lane.b32.xlu0 %v643_v45, %s768_s7  ;;  %347 = vrot.lane.b32.xlu1 %v644_v46, %s769_s10 }
  0x3f   : > { %536 = vperm.xlu1 %728, %v655_v54  }
  0x85   : > { %v382_v51 = vpop.permute.xlu0 %381  ;;  %v390_v52 = vpop.permute.xlu1 %389 }
  0x86   : > { %v408_v56 = vsel %vm350_vm0, %v282_v53, %v382_v51 }
  0x89   : > { %v386_v57 = vpop.permute.xlu0 %385  ;;  %v394_v58 = vpop.permute.xlu1 %393 }
  0x8a   : > { %v409_v59 = vsel %vm352_vm1, %v408_v56, %v386_v57 }
  0x8b   : > { %v410_v60 = vsel %vm354_vm2, %v409_v59, %v390_v52 }
  0x8c   : > { %v411_v61 = vsel %vm356_vm3, %v410_v60, %v394_v58 }
  0x8d   : > { %v398_v62 = vpop.permute.xlu0 %397  ;;  %v402_v63 = vpop.permute.xlu1 %401 }
  0x8e   : > { %v412_v0 = vsel %vm358_vm4, %v411_v61, %v398_v62 }
  0x8f   : > { %v413_v2 = vsel %vm360_vm5, %v412_v0, %v402_v63 }
  0x91   : > { %v406_v3 = vpop.permute.xlu0 %405  ;;  %v292_v4 = vpop.permute.xlu1 %291 }
  0x92   : > { %v414_v5 = vsel %vm362_vm6, %v413_v2, %v406_v3  ;;  %v351_v6 = vsel %vm350_vm0, %v259_v1, %v292_v4  ;;  %vm419_vm0 = vcmask 785408  }
  0x93   : > { %416 = vrot.lane.b32.xlu0 %v414_v5, %s771_s11 }
  0x95   : > { %v296_v7 = vpop.permute.xlu0 %295  ;;  %v300_v8 = vpop.permute.xlu1 %299 }
  0x96   : > { %v353_v9 = vsel %vm352_vm1, %v351_v6, %v296_v7 }
  0x97   : > { %v355_v10 = vsel %vm354_vm2, %v353_v9, %v300_v8  ;;  %vm541_vm2 = vcmask 257024  }
  0x99   : > { %v304_v11 = vpop.permute.xlu0 %303  ;;  %v308_v12 = vpop.permute.xlu1 %307 }
  0x9a   : > { %v357_v13 = vsel %vm356_vm3, %v355_v10, %v304_v11 }
  0x9b   : > { %v359_v14 = vsel %vm358_vm4, %v357_v13, %v308_v12 }
  0x9d   : > { %v312_v15 = vpop.permute.xlu0 %311  ;;  %v316_v17 = vpop.permute.xlu1 %315 }
  0x9e   : > { %v361_v16 = vsel %vm360_vm5, %v359_v14, %v312_v15 }
  0x9f   : > { %v363_v18 = vsel %vm362_vm6, %v361_v16, %v316_v17 }
  0xa1   : > { %v320_v19 = vpop.permute.xlu0 %319  ;;  %v324_v21 = vpop.permute.xlu1 %323 }
  0xa2   : > { %v365_v20 = vsel %vm364_vm7, %v363_v18, %v320_v19 }
  0xa3   : > { %v367_v22 = vsel %vm366_vm8, %v365_v20, %v324_v21 }
  0xa5   : > { %v328_v23 = vpop.permute.xlu0 %327  ;;  %v332_v25 = vpop.permute.xlu1 %331 }
  0xa6   : > { %v369_v24 = vsel %vm368_vm9, %v367_v22, %v328_v23 }
  0xa7   : > { %v371_v26 = vsel %vm370_vm10, %v369_v24, %v332_v25 }
  0xa9   : > { %v336_v27 = vpop.permute.xlu0 %335  ;;  %v340_v29 = vpop.permute.xlu1 %339 }
  0xaa   : > { %v373_v28 = vsel %vm372_vm11, %v371_v26, %v336_v27 }
  0xab   : > { %v375_v30 = vsel %vm374_vm12, %v373_v28, %v340_v29 }
  0xad   : > { %v344_v31 = vpop.permute.xlu0 %343  ;;  %v348_v33 = vpop.permute.xlu1 %347 }
  0xae   : > { %v377_v32 = vsel %vm376_vm13, %v375_v30, %v344_v31 }
  0xaf   : > { %v379_v34 = vsel %vm378_vm14, %v377_v32, %v348_v33 }
  0xbe   : > { %v537_v42 = vpop.permute.xlu1 %536 }
 0x105   : > { %v417_v35 = vpop.permute.xlu0 %416 }
 0x106   : > { %652 = vmatprep.mubr.msk.f32.mxu0 %vm439_vm15, %v417_v35  ;;  %v420_v36 = vsel %vm419_vm0, %v379_v34, %v417_v35 }
 0x107   : > { %507 = vmatmul.mubr.f32.vlgmr.msra.gmra.mrb[0].mxu0 %v420_v36 }
 0x1da   : > { %v508_v38 = vpop.f32.mrb[0].mxu0 }
 0x1db   : > { %v519_v40 = vmul.f32 %v653_v37, %v508_v38  ;;  %v510_v41 = vpop.f32.mrb[1].mxu0 }
 0x1dd   : > { %v527_v43 = vadd.f32 %v654_v39, %v519_v40 }
 0x1df   : > { %vm528_vm1 = vcmp.gt.f32.partialorder %v527_v43, 0.0  ;;  %v539_v44 = vmul.f32 %v537_v42, %v527_v43 }
 0x1e1   : > { %v540_v45 = vsel %vm528_vm1, %v527_v43, %v539_v44 }
 0x1e2   : > { %542 = vst.msk [vmem:[%s258_s18] sm:$0xf] %vm541_vm2, %v540_v45 }
 0x1e3 PF: > { %s17_s22 = sadd.s32 1, %s752_s22   ;;  %s965_s20 = smov %s748_s21 }
 0x1e4   : > { %p14_p5 = scmp.ge.s32.totalorder %s17_s22, 4   ;;  %s966_s21 = smov %s968_s4 }
 0x1e6   :  { %16 = sbr.rel (!%p14_p5) target bundleno = 3 (0x3), region = 77 }

</bundles_post_ra>
